<compile_context>
chip_gen: v7x
topology: tpu7x:2x2x1
jax: 0.10.0
libtpu: 0.0.40
codegen_flags: <defaults>
</compile_context>

<pallas_src>
import functools

import jax
import jax.numpy as jnp
from jax import lax
from jax.experimental import pallas as pl
from jax.experimental.pallas import tpu as pltpu

LANES = 128
# 2048 rows x 128 lanes x 4 B = 1 MiB per f32 input block; with double
# buffering and the bf16 label block this stays ~3 MiB of pipelined VMEM,
# comfortably under v5e's 16 MiB scoped default and v7x's 64 MiB physical VMEM.
MAX_BLOCK_ROWS = 2048


def _bce_kernel(p_ref, y_ref, o_ref, acc_ref, *, rows, row_tile, n_inner):
    c = pl.program_id(0)   # core slice (parallel axis, megacore on v7x)
    i = pl.program_id(1)   # chunk within this core slice (arbitrary axis)

    @pl.when(i == 0)
    def _():
        acc_ref[...] = jnp.zeros_like(acc_ref)

    # Unclamped global chunk index; rows past `rows` (partial last block, or the
    # duplicated clamped block on an odd chunk count) are masked to a value
    # that contributes exactly zero loss.
    chunk = c * n_inner + i
    row0 = chunk * row_tile
    global_row = row0 + lax.broadcasted_iota(jnp.int32, (row_tile, LANES), 0)
    valid = global_row < rows

    # Masked positions get p=1, y=1 -> loss contribution is exactly 0
    # (the -100 clamp is applied BEFORE multiplying by (1-y)=0, so no 0*inf).
    p = jnp.where(valid, p_ref[...].astype(jnp.float32), 1.0)
    y = jnp.where(valid, y_ref[...].astype(jnp.float32), 1.0)

    # PyTorch nn.BCELoss clamps log terms at -100 to avoid -inf.
    log_p = jnp.maximum(jnp.log(p), -100.0)
    log_1mp = jnp.maximum(jnp.log(1.0 - p), -100.0)
    # Keep the general y*log_p + (1-y)*log_1mp form so soft targets also match
    # nn.BCELoss semantics (the select-form micro-opt assumes exact 0/1 labels).
    loss = -(y * log_p + (1.0 - y) * log_1mp)

    # Per-lane partial sums in VMEM (sublane reduce only); no per-step scalar
    # SMEM read-modify-write chain, better accuracy for huge element counts.
    acc_ref[...] += jnp.sum(loss, axis=0, keepdims=True)

    @pl.when(i == n_inner - 1)
    def _():
        o_ref[...] = acc_ref[...].reshape(o_ref.shape)


def bce_loss(prediction, label):
    """Mean binary cross-entropy, matching torch.nn.BCELoss(reduction='mean')."""
    assert prediction.shape == label.shape
    n = prediction.size

    p_flat = prediction.reshape(-1).astype(jnp.float32)
    # Labels are 0/1 in the segmentation-style usage of this loss, so bf16 is a
    # lossless way to cut streamed label bytes in half on this mem-bound kernel.
    y_flat = label.reshape(-1).astype(jnp.bfloat16)

    # Only pad to the next multiple of 128 lanes (<= 127 elements), and only
    # when needed; the row-tile raggedness is handled in-kernel by masking, so
    # no full-size padded copies are materialized in the common case.
    rem = n % LANES
    if rem:
        pad = LANES - rem
        p_flat = jnp.concatenate([p_flat, jnp.ones((pad,), jnp.float32)])
        y_flat = jnp.concatenate([y_flat, jnp.ones((pad,), jnp.bfloat16)])

    rows = p_flat.shape[0] // LANES
    p2d = p_flat.reshape(rows, LANES)
    y2d = y_flat.reshape(rows, LANES)

    # Large blocks amortize per-grid-step pipeline overhead; small inputs use a
    # single full-extent block (always a legal block shape).
    row_tile = rows if rows <= MAX_BLOCK_ROWS else MAX_BLOCK_ROWS
    total_chunks = pl.cdiv(rows, row_tile)
    # Split the chunk axis across 2 TensorCores on v7x; harmless (sequential)
    # on v5e/v6e. Each core keeps its own VMEM accumulator and output row.
    num_slices = 2 if total_chunks >= 2 else 1
    n_inner = pl.cdiv(total_chunks, num_slices)

    def in_index(c, i):
        # Clamp so the DMA never starts past the array; the duplicated block
        # (odd chunk count) is zeroed out by the in-kernel row mask.
        return (jnp.minimum(c * n_inner + i, total_chunks - 1), 0)

    kernel = functools.partial(
        _bce_kernel, rows=rows, row_tile=row_tile, n_inner=n_inner
    )

    out = pl.pallas_call(
        kernel,
        out_shape=jax.ShapeDtypeStruct((num_slices, 1, LANES), jnp.float32),
        grid_spec=pltpu.PrefetchScalarGridSpec(
            num_scalar_prefetch=0,
            grid=(num_slices, n_inner),
            in_specs=[
                pl.BlockSpec((row_tile, LANES), in_index),
                pl.BlockSpec((row_tile, LANES), in_index),
            ],
            out_specs=pl.BlockSpec((1, 1, LANES), lambda c, i: (c, 0, 0)),
            scratch_shapes=[pltpu.VMEM((1, LANES), jnp.float32)],
        ),
        compiler_params=pltpu.CompilerParams(
            dimension_semantics=("parallel", "arbitrary"),
        ),
    )(p2d, y2d)

    # Tiny final reduction (num_slices x 128 lanes) + mean over the original
    # (unpadded, unmasked) element count.
    return jnp.sum(out) * jnp.float32(1.0 / float(n))


if __name__ == "__main__":
    key = jax.random.PRNGKey(0)
    k1, k2 = jax.random.split(key)

    # NCHW inputs, consistent with a segmentation-style BCE loss usage.
    shape = (2, 4, 16, 16)
    # prediction must lie in (0, 1) for BCELoss
    prediction = jax.nn.sigmoid(jax.random.normal(k1, shape, dtype=jnp.float32))
    label = (jax.random.uniform(k2, shape) > 0.5).astype(jnp.float32)

    loss = bce_loss(prediction, label)
    loss = jax.block_until_ready(loss)

    # Reference check against plain-JAX BCE (same -100 clamp semantics).
    ref = jnp.mean(
        -(label * jnp.maximum(jnp.log(prediction), -100.0)
          + (1.0 - label) * jnp.maximum(jnp.log(1.0 - prediction), -100.0))
    )
    assert jnp.allclose(loss, ref, rtol=1e-5, atol=1e-6), (loss, ref)

    print("KERNEL_OK")
</pallas_src>

<mosaic_0001>
module attributes {stable_mosaic.version = 11 : i64} {
  func.func @_bce_kernel(%arg0: i32, %arg1: i32, %arg2: memref<16x128xf32, #tpu.memory_space<vmem>>, %arg3: memref<16x128xbf16, #tpu.memory_space<vmem>>, %arg4: memref<1x1x128xf32, #tpu.memory_space<vmem>>, %arg5: memref<1x128xf32, #tpu.memory_space<vmem>>) attributes {dimension_semantics = [#tpu.dimension_semantics<parallel>, #tpu.dimension_semantics<arbitrary>], iteration_bounds = array<i64: 1, 1>, scalar_prefetch = 0 : i64, scratch_operands = 1 : i64, tpu.core_type = #tpu.core_type<tc>, window_params = [{transform_indices = @transform_0, window_bounds = array<i64: 16, 128>}, {transform_indices = @transform_1, window_bounds = array<i64: 16, 128>}, {transform_indices = @transform_2, window_bounds = array<i64: 1, 1, 128>}]} {
    %c0_i32 = arith.constant 0 : i32
    %0 = arith.cmpi eq, %arg1, %c0_i32 : i32
    %1 = arith.extui %0 : i1 to i32
    %c0_i32_0 = arith.constant 0 : i32
    %2 = arith.cmpi ne, %1, %c0_i32_0 : i32
    scf.if %2 {
      %cst_18 = arith.constant 0.000000e+00 : f32
      %41 = vector.broadcast %cst_18 : f32 to vector<1x128xf32>
      %c0_19 = arith.constant 0 : index
      %c0_20 = arith.constant 0 : index
      %42 = vector.load %arg5[%c0_19, %c0_20] : memref<1x128xf32, #tpu.memory_space<vmem>>, vector<1x128xf32>
      tpu.vector_store %arg5[%c0_19, %c0_20], %41 {strides = array<i32>} : memref<1x128xf32, #tpu.memory_space<vmem>>, vector<1x128xf32>,
    } else {
    }
    %c1_i32 = arith.constant 1 : i32
    %3 = arith.muli %arg0, %c1_i32 : i32
    %4 = arith.addi %3, %arg1 : i32
    %c16_i32 = arith.constant 16 : i32
    %5 = arith.muli %4, %c16_i32 : i32
    %6 = tpu.iota {dimensions = array<i32: 0>} : vector<16x128xi32>
    %7 = vector.broadcast %5 : i32 to vector<16x128xi32>
    %8 = arith.addi %7, %6 : vector<16x128xi32>
    %c16_i32_1 = arith.constant 16 : i32
    %9 = vector.broadcast %c16_i32_1 : i32 to vector<16x128xi32>
    %10 = arith.cmpi slt, %8, %9 : vector<16x128xi32>
    %c0 = arith.constant 0 : index
    %c0_2 = arith.constant 0 : index
    %11 = vector.load %arg2[%c0, %c0_2] : memref<16x128xf32, #tpu.memory_space<vmem>>, vector<16x128xf32>
    %cst = arith.constant 1.000000e+00 : f32
    %12 = vector.broadcast %cst : f32 to vector<16x128xf32>
    %13 = arith.select %10, %11, %12 : vector<16x128xi1>, vector<16x128xf32>
    %c0_3 = arith.constant 0 : index
    %c0_4 = arith.constant 0 : index
    %14 = vector.load %arg3[%c0_3, %c0_4] : memref<16x128xbf16, #tpu.memory_space<vmem>>, vector<16x128xbf16>
    %15 = arith.extf %14 : vector<16x128xbf16> to vector<16x128xf32>
    %cst_5 = arith.constant 1.000000e+00 : f32
    %16 = vector.broadcast %cst_5 : f32 to vector<16x128xf32>
    %17 = arith.select %10, %15, %16 : vector<16x128xi1>, vector<16x128xf32>
    %18 = math.log %13 : vector<16x128xf32>
    %cst_6 = arith.constant -1.000000e+02 : f32
    %19 = vector.broadcast %cst_6 : f32 to vector<16x128xf32>
    %20 = arith.maximumf %18, %19 : vector<16x128xf32>
    %cst_7 = arith.constant 1.000000e+00 : f32
    %21 = vector.broadcast %cst_7 : f32 to vector<16x128xf32>
    %22 = arith.subf %21, %13 : vector<16x128xf32>
    %23 = math.log %22 : vector<16x128xf32>
    %cst_8 = arith.constant -1.000000e+02 : f32
    %24 = vector.broadcast %cst_8 : f32 to vector<16x128xf32>
    %25 = arith.maximumf %23, %24 : vector<16x128xf32>
    %26 = arith.mulf %17, %20 : vector<16x128xf32>
    %cst_9 = arith.constant 1.000000e+00 : f32
    %27 = vector.broadcast %cst_9 : f32 to vector<16x128xf32>
    %28 = arith.subf %27, %17 : vector<16x128xf32>
    %29 = arith.mulf %28, %25 : vector<16x128xf32>
    %30 = arith.addf %26, %29 : vector<16x128xf32>
    %cst_10 = arith.constant 0.000000e+00 : f32
    %31 = vector.broadcast %cst_10 : f32 to vector<16x128xf32>
    %32 = arith.subf %31, %30 : vector<16x128xf32>
    %c0_11 = arith.constant 0 : index
    %c0_12 = arith.constant 0 : index
    %33 = vector.load %arg5[%c0_11, %c0_12] : memref<1x128xf32, #tpu.memory_space<vmem>>, vector<1x128xf32>
    %cst_13 = arith.constant dense<0.000000e+00> : vector<128xf32>
    %34 = vector.multi_reduction <add>, %32, %cst_13 [0] : vector<16x128xf32> to vector<128xf32>
    %35 = vector.shape_cast %34 : vector<128xf32> to vector<1x128xf32>
    %36 = arith.addf %33, %35 : vector<1x128xf32>
    %c0_14 = arith.constant 0 : index
    %c0_15 = arith.constant 0 : index
    %37 = vector.load %arg5[%c0_14, %c0_15] : memref<1x128xf32, #tpu.memory_space<vmem>>, vector<1x128xf32>
    tpu.vector_store %arg5[%c0_14, %c0_15], %36 {strides = array<i32>} : memref<1x128xf32, #tpu.memory_space<vmem>>, vector<1x128xf32>,
    %c0_i32_16 = arith.constant 0 : i32
    %38 = arith.cmpi eq, %arg1, %c0_i32_16 : i32
    %39 = arith.extui %38 : i1 to i32
    %c0_i32_17 = arith.constant 0 : i32
    %40 = arith.cmpi ne, %39, %c0_i32_17 : i32
    scf.if %40 {
      %c0_18 = arith.constant 0 : index
      %c0_19 = arith.constant 0 : index
      %41 = vector.load %arg5[%c0_18, %c0_19] : memref<1x128xf32, #tpu.memory_space<vmem>>, vector<1x128xf32>
      %42 = vector.shape_cast %41 : vector<1x128xf32> to vector<1x1x128xf32>
      %c0_20 = arith.constant 0 : index
      %c0_21 = arith.constant 0 : index
      %c0_22 = arith.constant 0 : index
      %43 = vector.load %arg4[%c0_20, %c0_21, %c0_22] : memref<1x1x128xf32, #tpu.memory_space<vmem>>, vector<1x1x128xf32>
      tpu.vector_store %arg4[%c0_20, %c0_21, %c0_22], %42 {strides = array<i32>} : memref<1x1x128xf32, #tpu.memory_space<vmem>>, vector<1x1x128xf32>,
    } else {
    }
    return
  }
  func.func @transform_0(%arg0: i32, %arg1: i32) -> (i32, i32) {
    %c1_i32 = arith.constant 1 : i32
    %0 = arith.muli %arg0, %c1_i32 : i32
    %1 = arith.addi %0, %arg1 : i32
    %c0_i32 = arith.constant 0 : i32
    %2 = arith.minsi %1, %c0_i32 : i32
    %c0_i32_0 = arith.constant 0 : i32
    %c0_i32_1 = arith.constant 0 : i32
    return %2, %c0_i32_0 : i32, i32
  }
  func.func @transform_1(%arg0: i32, %arg1: i32) -> (i32, i32) {
    %c1_i32 = arith.constant 1 : i32
    %0 = arith.muli %arg0, %c1_i32 : i32
    %1 = arith.addi %0, %arg1 : i32
    %c0_i32 = arith.constant 0 : i32
    %2 = arith.minsi %1, %c0_i32 : i32
    %c0_i32_0 = arith.constant 0 : i32
    %c0_i32_1 = arith.constant 0 : i32
    return %2, %c0_i32_0 : i32, i32
  }
  func.func @transform_2(%arg0: i32, %arg1: i32) -> (i32, i32, i32) {
    %c0_i32 = arith.constant 0 : i32
    %c0_i32_0 = arith.constant 0 : i32
    %c0_i32_1 = arith.constant 0 : i32
    return %arg0, %c0_i32, %c0_i32_0 : i32, i32, i32
  }
}

</mosaic_0001>

<bundles_post_ra>
// kernel: tpu_custom_call.1
= control target key start
LH: loop header
LB: loop body
LE: loop exit
PB: predicated region body
PF: predicated region fallthrough
CT: control target
= control target key end

     0   :  { %7 = vsyncpa [#allocation4], 0  ;;  %s295_s0 = inlined_call_operand.hbm [shape: f32[16,128], index: 0, kind: input, shape index: {}]   ;;  %s296_s1 = inlined_call_operand.hbm [shape: bf16[16,128], index: 1, kind: input, shape index: {}]   ;;  %s297_s2 = inlined_call_operand.hbm [shape: f32[1,1,128], index: 2, kind: output, shape index: {}]  }
   0x1   :  { %8 = vsyncpa [#allocation7], 0 }
   0x2   :  { %9 = vsyncpa [#allocation5], 0  ;;  %s236_s9 = smov [#allocation3]   ;;  %s164_s13 = scalar_lea.hbm %s295_s0, 256 }
   0x3   :  { %s21_s10 = sshll.u32 %s236_s9, 4  ;;  %p165_p0 = scmp.ne.s32.totalorder %s295_s0, %s164_s13  ;;  %s22_s10 = int_to_ptr.vmem [resolvable:$true] %s21_s10 }
   0x4   :  { %p168_p1 = scmp.lt.u32.totalorder %s164_s13, %s295_s0 }
   0x6   :  { %p170_p2 = pnand %p168_p1, %p165_p0 }
   0x8   :  { %173 = shalt.err (!%p170_p2)
}
   0x9   :  { %s174_s18 = scalar_lea.vmem %s22_s10, 256  ;;  %p179_p4 = scmp.lt.s32.totalorder %s22_s10, %s22_s10 }
   0xa   :  { %p175_p3 = scmp.ne.s32.totalorder %s22_s10, %s174_s18  ;;  %p180_p5 = scmp.lt.s32.totalorder %s174_s18, %s174_s18 }
   0xc   :  { %p181_p6 = por %p180_p5, %p179_p4 }
   0xe   :  { %p182_p7 = pnand %p181_p6, %p175_p3 }
  0x10   :  { %185 = shalt.err (!%p182_p7)
}
  0x11   :  { %s237_s19 = smov 128   ;;  %s238_s20 = smov 8  }
  0x12   :  { %27 = dma.hbm_to_vmem [thread:$0]  %s295_s0, 256, %s22_s10, [#allocation4], %s237_s19, %s237_s19, %s238_s20  }
  0x13   :  { %s239_s23 = smov [#allocation6]   ;;  %s186_s27 = scalar_lea.hbm %s296_s1, 128 }
  0x14   :  { %s39_s24 = sshll.u32 %s239_s23, 4  ;;  %p187_p8 = scmp.ne.s32.totalorder %s296_s1, %s186_s27  ;;  %s40_s24 = int_to_ptr.vmem [resolvable:$true] %s39_s24 }
  0x15   :  { %p190_p9 = scmp.lt.u32.totalorder %s186_s27, %s296_s1 }
  0x17   :  { %p192_p10 = pnand %p190_p9, %p187_p8 }
  0x19   :  { %195 = shalt.err (!%p192_p10)
}
  0x1a   :  { %s196_s4 = scalar_lea.vmem %s40_s24, 128  ;;  %p201_p12 = scmp.lt.s32.totalorder %s40_s24, %s40_s24 }
  0x1b   :  { %p197_p11 = scmp.ne.s32.totalorder %s40_s24, %s196_s4  ;;  %p202_p13 = scmp.lt.s32.totalorder %s196_s4, %s196_s4 }
  0x1d   :  { %p203_p0 = por %p202_p13, %p201_p12 }
  0x1f   :  { %p204_p1 = pnand %p203_p0, %p197_p11 }
  0x21   :  { %207 = shalt.err (!%p204_p1)
}
  0x22   :  { %s240_s0 = smov 64   ;;  %s241_s5 = smov 4  }
  0x23   :  { %45 = dma.hbm_to_vmem [thread:$0]  %s296_s1, 128, %s40_s24, [#allocation7], %s240_s0, %s240_s0, %s241_s5  }
  0x24   :  { %230 = dma.done.wait [#allocation4], 256  }
  0x25   :  { %231 = vsyncadd [#allocation4], 4294967040 }
  0x26   :  { %232 = dma.done.wait [#allocation7], 128  }
  0x27   :  { %233 = vsyncadd [#allocation7], 4294967168  ;;  %v242_v0 = vmov 0.0   ;;  %v75_v1 = vld [vmem:[#allocation3] sm:$0xff]  ;;  %v76_v2 = vld [vmem:[#allocation3 + $0x8] sm:$0xff]  ;;  %s243_s1 = smov [#allocation8]  }
  0x28   :  { %64 = vst [vmem:[#allocation2] sm:$0x1] %v242_v0  ;;  %156 = vlog2.f32 %v75_v1  ;;  %v91_v3 = vsub.f32 1.0, %v75_v1  ;;  %v92_v4 = vsub.f32 1.0, %v76_v2  ;;  %v145_v5 = vld [vmem:[#allocation6] sm:$0xff]   ;;  %s130_s8 = sshll.u32 %s243_s1, 4  ;;  %s131_s8 = int_to_ptr.vmem [resolvable:$true] %s130_s8 }
  0x29   :  { %158 = vlog2.f32 %v76_v2  ;;  %v146_v6 = vunpack.c.l.bf16 %v145_v5  ;;  %v147_v8 = vunpack.c.h.bf16 %v145_v5  ;;  %s208_s9 = scalar_lea.vmem %s131_s8, 16  ;;  %s212_s10 = scalar_lea.vmem %s131_s8, 32 }
  0x2a   :  { %160 = vlog2.f32 %v91_v3  ;;  %p209_p2 = scmp.ne.s32.totalorder %s131_s8, %s208_s9  ;;  %p213_p3 = scmp.lt.s32.totalorder %s131_s8, %s131_s8 }
  0x2b   :  { %162 = vlog2.f32 %v92_v4  ;;  %v101_v16 = vsub.f32 1.0, %v146_v6  ;;  %v102_v19 = vsub.f32 1.0, %v147_v8  ;;  %p214_p4 = scmp.lt.s32.totalorder %s212_s10, %s208_s9 }
  0x2d   :  { %p215_p5 = por %p214_p4, %p213_p3 }
  0x2f   :  { %v109_v36 = vld [vmem:[#allocation2] sm:$0x1]  ;;  %p216_p6 = pnand %p215_p5, %p209_p2 }
  0x32   :  { %v157_v7 = vpop.eup %156 }
  0x33   :  { %v159_v9 = vpop.eup %158  ;;  %v86_v10 = vmul.f32 0.6931472, %v157_v7 }
  0x34   :  { %v161_v11 = vpop.eup %160  ;;  %v88_v12 = vmul.f32 0.6931472, %v159_v9 }
  0x35   :  { %v163_v13 = vpop.eup %162  ;;  %v89_v14 = vmax.f32 %v86_v10, -100.0  ;;  %v94_v15 = vmul.f32 0.6931472, %v161_v11 }
  0x36   :  { %v90_v17 = vmax.f32 %v88_v12, -100.0  ;;  %v96_v18 = vmul.f32 0.6931472, %v163_v13 }
  0x37   :  { %v97_v20 = vmax.f32 %v94_v15, -100.0  ;;  %v99_v21 = vmul.f32 %v146_v6, %v89_v14 }
  0x38   :  { %v98_v22 = vmax.f32 %v96_v18, -100.0  ;;  %v100_v23 = vmul.f32 %v147_v8, %v90_v17 }
  0x39   :  { %v103_v24 = vmul.f32 %v101_v16, %v97_v20 }
  0x3a   :  { %v104_v25 = vmul.f32 %v102_v19, %v98_v22 }
  0x3b   :  { %v105_v26 = vadd.f32 %v103_v24, %v99_v21 }
  0x3c   :  { %v106_v27 = vadd.f32 %v104_v25, %v100_v23 }
  0x3d   :  { %v107_v28 = vsub.f32 0.0, %v105_v26 }
  0x3e   :  { %v108_v29 = vsub.f32 0.0, %v106_v27 }
  0x40   :  { %v110_v30 = vadd.f32 %v108_v29, %v107_v28 }
  0x42   :  { %v111_v31 = vrot.slane %v110_v30, 4 }
  0x44   :  { %v112_v32 = vadd.f32 %v111_v31, %v110_v30 }
  0x46   :  { %v113_v33 = vrot.slane %v112_v32, 2 }
  0x48   :  { %v114_v34 = vadd.f32 %v113_v33, %v112_v32 }
  0x4a   :  { %v115_v35 = vrot.slane %v114_v34, 1 }
  0x4c   :  { %v116_v37 = vadd.f32 %v115_v35, %v114_v34 }
  0x4e   :  { %v117_v38 = vadd.f32 %v116_v37, %v109_v36 }
  0x50   :  { %118 = vst [vmem:[#allocation2] sm:$0x1] %v117_v38 }
  0x57   :  { %v122_v39 = vld [vmem:[#allocation2] sm:$0x1] }
  0x58   :  { %123 = vst [vmem:[#allocation8] sm:$0x1] %v122_v39 }
  0x59   :  { %219 = shalt.err (!%p216_p6)
}
  0x5a   :  { %s220_s13 = scalar_lea.hbm %s297_s2, 16 }
  0x5b   :  { %p221_p7 = scmp.ne.s32.totalorder %s297_s2, %s220_s13  ;;  %p224_p8 = scmp.lt.u32.totalorder %s220_s13, %s297_s2 }
  0x5d   :  { %p226_p9 = pnand %p224_p8, %p221_p7 }
  0x5f   :  { %229 = shalt.err (!%p226_p9)
}
  0x60   :  { %133 = dma.vmem_to_hbm [thread:$0]  %s131_s8, 16, %s297_s2, [#allocation5]  }
  0x61   :  { %234 = dma.done.wait [#allocation5], 16  }
  0x62   :  { %235 = vsyncadd [#allocation5], 4294967280 }
  0x63   :  { %137 = vsyncpa [#allocation4], 1 }
  0x64   :  { %138 = vsyncpa [#allocation7], 1 }
  0x65   :  { %139 = vsyncpa [#allocation5], 1 }

</bundles_post_ra>
